<compile_context>
chip_gen: v7x
topology: tpu7x:2x2x1
jax: 0.10.0
libtpu: 0.0.40
codegen_flags: <defaults>
</compile_context>

<pallas_src>
import jax
import jax.numpy as jnp
import numpy as np
from jax.experimental import pallas as pl
from jax.experimental.pallas import tpu as pltpu


def readout_kernel(x_ref, w_ref, b_ref, o_ref):
    """x_ref: (bt, K) bf16   w_ref: (K, bd) bf16   b_ref: (1, bd) f32   o_ref: (bt, bd)."""
    # Single fused spatial + channel + feature contraction on the MXU, f32 accumulation.
    acc = jnp.dot(x_ref[...], w_ref[...], preferred_element_type=jnp.float32)
    # Epilogue: bias + numerically-stable softplus (scale already folded into the weight).
    z = acc + b_ref[...]
    sp = jnp.maximum(z, 0.0) + jnp.log1p(jnp.exp(-jnp.abs(z)))
    o_ref[...] = sp.astype(o_ref.dtype)


def make_mask_grid(outdims: int, w: int, h: int) -> jnp.ndarray:
    """Same as the PyTorch staticmethod (w/h axes deliberately 'mixed up')."""
    m = max(w, h)
    grid_w = jnp.linspace(-1.0 * w / m, 1.0 * w / m, w)
    grid_h = jnp.linspace(-1.0 * h / m, 1.0 * h / m, h)
    xx, yy = jnp.meshgrid(grid_w, grid_h, indexing="ij")
    g = jnp.stack([xx, yy], axis=2)[None, ...]            # (1, w, h, 2)
    return jnp.tile(g, (outdims, 1, 1, 1))                # (outdims, w, h, 2)


def get_mask(mask_mean, mask_log_var, grid, outdims,
             gaussian_mean_scale=1.0, gaussian_var_scale=1.0):
    """Gaussian PDF mask per neuron (parameter transform; plain-JAX glue, O(D*W*H))."""
    scaled_log_var = mask_log_var * gaussian_var_scale
    mask_var = jnp.exp(jnp.clip(scaled_log_var, -20.0, 20.0)).reshape(-1, 1, 1)
    pdf = grid - mask_mean.reshape(outdims, 1, 1, -1) * gaussian_mean_scale
    pdf = jnp.sum(pdf ** 2, axis=-1) / (mask_var + 1e-8)
    pdf = jnp.exp(-0.5 * jnp.minimum(pdf, 20.0))          # clamp(max=20)
    normalisation = jnp.sum(pdf, axis=(1, 2), keepdims=True)
    return jnp.nan_to_num(pdf / normalisation)            # (outdims, w, h)


def _round_up(x: int, m: int) -> int:
    return ((x + m - 1) // m) * m


def _vmem_capacity_bytes() -> int:
    """Per-generation VMEM capacity (64 MiB v7x, 128 MiB v5e/v6e); conservative fallback."""
    try:
        return int(pltpu.get_tpu_info().vmem_capacity_bytes)
    except Exception:
        return 64 * 1024 * 1024


def _choose_tiles(t, k_pad, d_out, x_itemsize, w_itemsize, o_itemsize, vmem_cap):
    """Pick (block_t, block_d, vmem_limit_bytes) from the generation's VMEM capacity."""
    vmem_limit = (3 * vmem_cap) // 4                      # 48 MiB on v7x, 96 MiB on v5e/v6e
    budget = vmem_limit - (4 << 20)                       # headroom for Mosaic scratch
    bt_target = 256 if vmem_cap <= (64 << 20) else 512    # bigger T tiles where VMEM allows

    # D tile: keep the fused weight fully resident for modest outdims; otherwise add an
    # innermost D grid axis with lane-dense 512/256/128-wide weight slabs.
    bd = d_out if d_out <= 512 else 512

    def weight_bytes(bd_):
        n_d = -(-d_out // bd_)
        mult = 1 if n_d == 1 else 2       # resident single copy vs double-buffered stream
        return mult * k_pad * bd_ * w_itemsize

    while bd > 128 and weight_bytes(bd) > budget // 2:
        bd = max(128, ((bd // 2) // 128) * 128)

    row = 16 if x_itemsize < 4 else 8     # bf16 packs two rows per sublane
    bt = bt_target
    while bt > row:
        x_bytes = 2 * bt * k_pad * x_itemsize             # double-buffered x tile
        o_bytes = 2 * bt * bd * o_itemsize                # double-buffered output tile
        if weight_bytes(bd) + x_bytes + o_bytes <= budget:
            break
        bt //= 2
    if t <= bt:
        bt = t                                            # full-extent block always legal
    else:
        bt = max(row, (bt // row) * row)
    return bt, bd, vmem_limit


def simple_spatial_x_feature_3d(x, mask_mean, mask_log_var, grid, features,
                                scale_param, bias_param,
                                gaussian_mean_scale=1.0, gaussian_var_scale=1.0,
                                compute_dtype=jnp.bfloat16):
    """Pallas-backed forward pass.  x: (N, C, T, W, H) float32 -> (N, T, D)."""
    n, c, t, w, h = x.shape
    d = features.shape[-1]
    wh = w * h
    k = c * wh
    k_pad = _round_up(k, 128)                             # lane-dense contraction dim

    # Fused weight: W[(c,wh), d] = mask[wh, d] * feature[c, d] * scale[d]
    masks = get_mask(mask_mean, mask_log_var, grid, d,
                     gaussian_mean_scale, gaussian_var_scale)          # (d, w, h)
    masks_whd = jnp.transpose(masks, (1, 2, 0)).reshape(wh, d)         # (WH, D)
    feats = features.reshape(c, d)                                     # (C, D)
    w_fused = (masks_whd[None, :, :] * feats[:, None, :]
               * scale_param.reshape(1, 1, d)).reshape(k, d)

    # Output width: unpadded for small D (no padded buffer, no slice pass), lane-dense
    # 128-multiple otherwise (sliced once at the end).
    d_out = d if (d <= 128 or d % 128 == 0) else _round_up(d, 128)

    w_fused = jnp.pad(w_fused, ((0, k_pad - k), (0, d_out - d))).astype(compute_dtype)
    bias2 = jnp.pad(bias_param.reshape(1, d), ((0, 0), (0, d_out - d))).astype(jnp.float32)

    # x: (N,C,T,W,H) -> (N,T,C*WH) bf16 (single fused XLA transpose+cast(+pad) pass).
    x_t = jnp.transpose(x.reshape(n, c, t, wh), (0, 2, 1, 3)).reshape(n, t, k)
    if k_pad != k:
        x_t = jnp.pad(x_t, ((0, 0), (0, 0), (0, k_pad - k)))
    x_t = x_t.astype(compute_dtype)

    vmem_cap = _vmem_capacity_bytes()
    block_t, block_d, vmem_limit = _choose_tiles(
        t, k_pad, d_out,
        jnp.dtype(compute_dtype).itemsize, jnp.dtype(compute_dtype).itemsize,
        jnp.dtype(x.dtype).itemsize, vmem_cap)
    nt = pl.cdiv(t, block_t)
    nd = pl.cdiv(d_out, block_d)

    # x tile index_map ignores the D axis -> the same x block stays resident (no re-DMA)
    # across the innermost D loop.
    x_spec = pl.BlockSpec((None, block_t, k_pad), lambda nb, tb, db: (nb, tb, 0))
    out_spec = pl.BlockSpec((None, block_t, block_d), lambda nb, tb, db: (nb, tb, db))
    cparams = pltpu.CompilerParams(
        dimension_semantics=("parallel", "parallel", "parallel"),
        vmem_limit_bytes=vmem_limit,
    )

    def call(w_spec, b_spec):
        return pl.pallas_call(
            readout_kernel,
            out_shape=jax.ShapeDtypeStruct((n, t, d_out), x.dtype),
            grid_spec=pltpu.PrefetchScalarGridSpec(
                num_scalar_prefetch=0,
                grid=(n, nt, nd),
                in_specs=[x_spec, w_spec, b_spec],
                out_specs=out_spec,
            ),
            compiler_params=cparams,
        )(x_t, w_fused, bias2)

    if nd == 1:
        try:
            # Grid-constant operands as whole-array VMEM refs: copied in once and NOT
            # double-buffered (single-buffer the resident weight/bias).
            out = call(pl.BlockSpec(memory_space=pltpu.MemorySpace.VMEM),
                       pl.BlockSpec(memory_space=pltpu.MemorySpace.VMEM))
        except Exception:
            # Fallback: full-shape pipelined specs (double-buffered, still correct).
            out = call(pl.BlockSpec((k_pad, block_d), lambda nb, tb, db: (0, 0)),
                       pl.BlockSpec((1, block_d), lambda nb, tb, db: (0, 0)))
    else:
        # Large outdims: stream lane-dense weight/bias slabs over the innermost D axis.
        out = call(pl.BlockSpec((k_pad, block_d), lambda nb, tb, db: (0, db)),
                   pl.BlockSpec((1, block_d), lambda nb, tb, db: (0, db)))

    return out if d_out == d else out[:, :, :d]           # drop lane padding -> (N, T, D)


def reference_forward(x, mask_mean, mask_log_var, grid, features,
                      scale_param, bias_param):
    """Pure-JAX replica of the PyTorch forward, used only for verification."""
    d = features.shape[-1]
    masks = get_mask(mask_mean, mask_log_var, grid, d).transpose(1, 2, 0)  # (w, h, d)
    y = jnp.einsum("nctwh,whd->nctd", x, masks,
                   precision=jax.lax.Precision.HIGHEST)
    y = (y * features).sum(axis=1)                                          # (n, t, d)
    return jax.nn.softplus(y * scale_param + bias_param)


if __name__ == "__main__":
    # small shapes consistent with in_shape=(c, t, w, h) and outdims
    N, C, T, W, H = 2, 4, 8, 16, 16
    OUTDIMS = 16

    key = jax.random.PRNGKey(0)
    k_x, k_mean, k_lvar, k_feat = jax.random.split(key, 4)

    x = jax.random.normal(k_x, (N, C, T, W, H), dtype=jnp.float32)

    # parameters, deterministic init mirroring the module's __init__
    mask_mean = 0.1 * jax.random.normal(k_mean, (OUTDIMS, 2), dtype=jnp.float32)
    mask_log_var = 0.1 * jax.random.normal(k_lvar, (OUTDIMS,), dtype=jnp.float32)
    grid_param = make_mask_grid(OUTDIMS, W, H).astype(jnp.float32)
    features = (1.0 / C + 0.01 * jax.random.normal(
        k_feat, (1, C, 1, OUTDIMS), dtype=jnp.float32))
    scale_param = jnp.ones((OUTDIMS,), dtype=jnp.float32)   # scale=False -> ones
    bias_param = jnp.zeros((OUTDIMS,), dtype=jnp.float32)   # bias init -> zeros

    out = simple_spatial_x_feature_3d(
        x, mask_mean, mask_log_var, grid_param, features, scale_param, bias_param)
    out = jax.block_until_ready(out)

    ref = reference_forward(
        x, mask_mean, mask_log_var, grid_param, features, scale_param, bias_param)
    ref = jax.block_until_ready(ref)

    assert out.shape == (N, T, OUTDIMS), out.shape
    # bf16 x / bf16 fused weight with f32 accumulation: tolerance sized for bf16 rounding.
    np.testing.assert_allclose(np.asarray(out), np.asarray(ref), rtol=5e-3, atol=5e-3)

    print("KERNEL_OK")
</pallas_src>

<mosaic_0001>
module attributes {stable_mosaic.version = 11 : i64} {
  func.func @readout_kernel(%arg0: i32, %arg1: i32, %arg2: i32, %arg3: memref<1x8x1024xbf16, #tpu.memory_space<vmem>>, %arg4: memref<1024x16xbf16, #tpu.memory_space<vmem>>, %arg5: memref<1x16xf32, #tpu.memory_space<vmem>>, %arg6: memref<1x8x16xf32, #tpu.memory_space<vmem>>) attributes {dimension_semantics = [#tpu.dimension_semantics<parallel>, #tpu.dimension_semantics<parallel>, #tpu.dimension_semantics<parallel>], iteration_bounds = array<i64: 2, 1, 1>, scalar_prefetch = 0 : i64, scratch_operands = 0 : i64, tpu.core_type = #tpu.core_type<tc>, window_params = [{transform_indices = @transform_0, window_bounds = array<i64: 1, 8, 1024>}, {pipeline_mode = #tpu.pipeline_mode<synchronous>, transform_indices = @transform_1, window_bounds = array<i64: 1024, 16>}, {pipeline_mode = #tpu.pipeline_mode<synchronous>, transform_indices = @transform_2, window_bounds = array<i64: 1, 16>}, {transform_indices = @transform_3, window_bounds = array<i64: 1, 8, 16>}]} {
    %c0 = arith.constant 0 : index
    %c0_0 = arith.constant 0 : index
    %c0_1 = arith.constant 0 : index
    %0 = vector.load %arg3[%c0, %c0_0, %c0_1] : memref<1x8x1024xbf16, #tpu.memory_space<vmem>>, vector<1x8x1024xbf16>
    %1 = vector.shape_cast %0 : vector<1x8x1024xbf16> to vector<8x1024xbf16>
    %c0_2 = arith.constant 0 : index
    %c0_3 = arith.constant 0 : index
    %2 = vector.load %arg4[%c0_2, %c0_3] : memref<1024x16xbf16, #tpu.memory_space<vmem>>, vector<1024x16xbf16>
    %cst = arith.constant dense<0.000000e+00> : vector<8x16xf32>
    %3 = tpu.matmul %1, %2, %cst {dimension_numbers = #tpu.dot_dimension_numbers<[1], [0], [0], [1], [0, 0, 1, 1], [], []>} : vector<8x1024xbf16>, vector<1024x16xbf16>, vector<8x16xf32> -> vector<8x16xf32>
    %c0_4 = arith.constant 0 : index
    %c0_5 = arith.constant 0 : index
    %4 = vector.load %arg5[%c0_4, %c0_5] : memref<1x16xf32, #tpu.memory_space<vmem>>, vector<1x16xf32>
    %5 = vector.broadcast %4 : vector<1x16xf32> to vector<8x16xf32>
    %6 = arith.addf %3, %5 : vector<8x16xf32>
    %cst_6 = arith.constant 0.000000e+00 : f32
    %7 = vector.broadcast %cst_6 : f32 to vector<8x16xf32>
    %8 = arith.maximumf %6, %7 : vector<8x16xf32>
    %9 = math.absf %6 : vector<8x16xf32>
    %cst_7 = arith.constant 0.000000e+00 : f32
    %10 = vector.broadcast %cst_7 : f32 to vector<8x16xf32>
    %11 = arith.subf %10, %9 : vector<8x16xf32>
    %12 = math.exp %11 : vector<8x16xf32>
    %13 = math.log1p %12 : vector<8x16xf32>
    %14 = arith.addf %8, %13 : vector<8x16xf32>
    %c0_8 = arith.constant 0 : index
    %c0_9 = arith.constant 0 : index
    %c0_10 = arith.constant 0 : index
    %15 = vector.load %arg6[%c0_8, %c0_9, %c0_10] : memref<1x8x16xf32, #tpu.memory_space<vmem>>, vector<1x8x16xf32>
    %16 = vector.shape_cast %15 : vector<1x8x16xf32> to vector<8x16xf32>
    %17 = vector.shape_cast %14 : vector<8x16xf32> to vector<1x8x16xf32>
    tpu.vector_store %arg6[%c0_8, %c0_9, %c0_10], %17 {strides = array<i32>} : memref<1x8x16xf32, #tpu.memory_space<vmem>>, vector<1x8x16xf32>,
    return
  }
  func.func @transform_0(%arg0: i32, %arg1: i32, %arg2: i32) -> (i32, i32, i32) {
    %c0_i32 = arith.constant 0 : i32
    %c0_i32_0 = arith.constant 0 : i32
    return %arg0, %arg1, %c0_i32 : i32, i32, i32
  }
  func.func @transform_1(%arg0: i32, %arg1: i32, %arg2: i32) -> (i32, i32) {
    %c0_i32 = arith.constant 0 : i32
    %c0_i32_0 = arith.constant 0 : i32
    %c0_i32_1 = arith.constant 0 : i32
    return %c0_i32, %c0_i32_0 : i32, i32
  }
  func.func @transform_2(%arg0: i32, %arg1: i32, %arg2: i32) -> (i32, i32) {
    %c0_i32 = arith.constant 0 : i32
    %c0_i32_0 = arith.constant 0 : i32
    %c0_i32_1 = arith.constant 0 : i32
    return %c0_i32, %c0_i32_0 : i32, i32
  }
  func.func @transform_3(%arg0: i32, %arg1: i32, %arg2: i32) -> (i32, i32, i32) {
    %c0_i32 = arith.constant 0 : i32
    return %arg0, %arg1, %arg2 : i32, i32, i32
  }
}

module attributes {stable_mosaic.version = 11 : i64} {
  func.func @readout_kernel(%arg0: i32, %arg1: i32, %arg2: i32, %arg3: memref<1x8x1024xbf16, #tpu.memory_space<vmem>>, %arg4: memref<1024x16xbf16, #tpu.memory_space<vmem>>, %arg5: memref<1x16xf32, #tpu.memory_space<vmem>>, %arg6: memref<1x8x16xf32, #tpu.memory_space<vmem>>) attributes {dimension_semantics = [#tpu.dimension_semantics<parallel>, #tpu.dimension_semantics<parallel>, #tpu.dimension_semantics<parallel>], iteration_bounds = array<i64: 2, 1, 1>, scalar_prefetch = 0 : i64, scratch_operands = 0 : i64, tpu.core_type = #tpu.core_type<tc>, window_params = [{transform_indices = @transform_0, window_bounds = array<i64: 1, 8, 1024>}, {pipeline_mode = #tpu.pipeline_mode<synchronous>, transform_indices = @transform_1, window_bounds = array<i64: 1024, 16>}, {pipeline_mode = #tpu.pipeline_mode<synchronous>, transform_indices = @transform_2, window_bounds = array<i64: 1, 16>}, {transform_indices = @transform_3, window_bounds = array<i64: 1, 8, 16>}]} {
    %c0 = arith.constant 0 : index
    %c0_0 = arith.constant 0 : index
    %c0_1 = arith.constant 0 : index
    %0 = vector.load %arg3[%c0, %c0_0, %c0_1] : memref<1x8x1024xbf16, #tpu.memory_space<vmem>>, vector<1x8x1024xbf16>
    %1 = vector.shape_cast %0 : vector<1x8x1024xbf16> to vector<8x1024xbf16>
    %c0_2 = arith.constant 0 : index
    %c0_3 = arith.constant 0 : index
    %2 = vector.load %arg4[%c0_2, %c0_3] : memref<1024x16xbf16, #tpu.memory_space<vmem>>, vector<1024x16xbf16>
    %cst = arith.constant dense<0.000000e+00> : vector<8x16xf32>
    %3 = tpu.matmul %1, %2, %cst {dimension_numbers = #tpu.dot_dimension_numbers<[1], [0], [0], [1], [0, 0, 1, 1], [], []>} : vector<8x1024xbf16>, vector<1024x16xbf16>, vector<8x16xf32> -> vector<8x16xf32>
    %c0_4 = arith.constant 0 : index
    %c0_5 = arith.constant 0 : index
    %4 = vector.load %arg5[%c0_4, %c0_5] : memref<1x16xf32, #tpu.memory_space<vmem>>, vector<1x16xf32>
    %5 = vector.broadcast %4 : vector<1x16xf32> to vector<8x16xf32>
    %6 = arith.addf %3, %5 : vector<8x16xf32>
    %cst_6 = arith.constant 0.000000e+00 : f32
    %7 = vector.broadcast %cst_6 : f32 to vector<8x16xf32>
    %8 = arith.maximumf %6, %7 : vector<8x16xf32>
    %9 = math.absf %6 : vector<8x16xf32>
    %cst_7 = arith.constant 0.000000e+00 : f32
    %10 = vector.broadcast %cst_7 : f32 to vector<8x16xf32>
    %11 = arith.subf %10, %9 : vector<8x16xf32>
    %12 = math.exp %11 : vector<8x16xf32>
    %13 = math.log1p %12 : vector<8x16xf32>
    %14 = arith.addf %8, %13 : vector<8x16xf32>
    %c0_8 = arith.constant 0 : index
    %c0_9 = arith.constant 0 : index
    %c0_10 = arith.constant 0 : index
    %15 = vector.load %arg6[%c0_8, %c0_9, %c0_10] : memref<1x8x16xf32, #tpu.memory_space<vmem>>, vector<1x8x16xf32>
    %16 = vector.shape_cast %15 : vector<1x8x16xf32> to vector<8x16xf32>
    %17 = vector.shape_cast %14 : vector<8x16xf32> to vector<1x8x16xf32>
    tpu.vector_store %arg6[%c0_8, %c0_9, %c0_10], %17 {strides = array<i32>} : memref<1x8x16xf32, #tpu.memory_space<vmem>>, vector<1x8x16xf32>,
    return
  }
  func.func @transform_0(%arg0: i32, %arg1: i32, %arg2: i32) -> (i32, i32, i32) {
    %c0_i32 = arith.constant 0 : i32
    %c0_i32_0 = arith.constant 0 : i32
    return %arg0, %arg1, %c0_i32 : i32, i32, i32
  }
  func.func @transform_1(%arg0: i32, %arg1: i32, %arg2: i32) -> (i32, i32) {
    %c0_i32 = arith.constant 0 : i32
    %c0_i32_0 = arith.constant 0 : i32
    %c0_i32_1 = arith.constant 0 : i32
    return %c0_i32, %c0_i32_0 : i32, i32
  }
  func.func @transform_2(%arg0: i32, %arg1: i32, %arg2: i32) -> (i32, i32) {
    %c0_i32 = arith.constant 0 : i32
    %c0_i32_0 = arith.constant 0 : i32
    %c0_i32_1 = arith.constant 0 : i32
    return %c0_i32, %c0_i32_0 : i32, i32
  }
  func.func @transform_3(%arg0: i32, %arg1: i32, %arg2: i32) -> (i32, i32, i32) {
    %c0_i32 = arith.constant 0 : i32
    return %arg0, %arg1, %arg2 : i32, i32, i32
  }
}

</mosaic_0001>

<bundles_post_ra>
// kernel: tpu_custom_call.1
= control target key start
LH: loop header
LB: loop body
LE: loop exit
PB: predicated region body
PF: predicated region fallthrough
CT: control target
= control target key end

     0   :  { %8 = vsyncpa [#allocation3], 0  ;;  %s1751_s0 = inlined_call_operand.vmem [shape: bf16[2,8,1024], index: 0, kind: input, shape index: {}]   ;;  %s1752_s1 = inlined_call_operand.vmem [shape: bf16[1024,16], index: 1, kind: input, shape index: {}]   ;;  %s1753_s2 = inlined_call_operand.vmem [shape: f32[1,16], index: 2, kind: input, shape index: {}]   ;;  %s1754_s3 = inlined_call_operand.hbm [shape: f32[2,8,16], index: 3, kind: output, shape index: {}]  }
   0x1   :  { %10 = vsyncpa [#allocation3 + $0x1], 0  ;;  %s1438_s12 = smov 0   ;;  %s1440_s13 = smov 0  }
   0x2   :  { %s1442_s14 = smov 0   ;;  %s1444_s15 = smov 0  }
   0x3   :  { %s1446_s16 = smov 0   ;;  %s1448_s17 = smov 0  }
   0x4 LB: > { %s1032_s18 = sadd.s32 4294967295, %s1415_s17   ;;  %s1033_s19 = sadd.s32 4294967294, %s1415_s17   ;;  %s1415_s17 = sphi %s1448_s17, %s16_s17   ;;  %s1411_s16 = sphi %s1446_s16, %s1761_s16   ;;  %s1407_s15 = sphi %s1444_s15, %s1760_s15   ;;  %s1403_s14 = sphi %s1442_s14, %s1759_s14   ;;  %s1399_s13 = sphi %s1440_s13, %s1758_s13   ;;  %s1395_s12 = sphi %s1438_s12, %s1757_s12  }
   0x5   : > { %s35_s20 = sadd.s32 1, %s1411_s16  ;;  %s116_s21 = sadd.s32 1, %s1403_s14 }
   0x6   : > { %p37_p0 = scmp.ge.s32.totalorder %s35_s20, 2  ;;  %p126_p1 = scmp.ne.s32.totalorder %s1403_s14, %s1399_s13 }
   0x7   : > { %p127_p2 = scmp.eq.s32.totalorder %s1032_s18, 1  ;;  %p132_p3 = scmp.ne.s32.totalorder %s1399_s13, %s1395_s12 }
   0x8   : > { %s1763_s20 = smov (%p37_p0, %s35_s20), 0  ;;  %p133_p5 = scmp.eq.s32.totalorder %s1033_s19, 1 }
   0x9   : > { %p1478_p4 = por %p127_p2, %p126_p1  ;;  %s109_s23 = ssub.s32 %s1411_s16, %s1763_s20 }
   0xa   : > { %p1036_p6 = scmp.ge.s32.totalorder %s1415_s17, 1  ;;  %p114_p7 = scmp.eq.s32.totalorder %s109_s23, 0 }
   0xb   : > { %p1485_p8 = por %p133_p5, %p132_p3  ;;  %p169_p9 = scmp.lt.s32.totalorder %s1415_s17, 3 }
   0xc   : > { %s1491_s25 = scalar_select %p114_p7, %s1403_s14, %s116_s21  }
   0xd   : > { %p170_p10 = pnand %p1036_p6, %p169_p9 }
   0xe   : > { %v1261_v0 = vld [vmem:[%s1752_s1 + $0x40] sm:$0xff] (!%p170_p10)   ;;  %v1265_v4 = vld [vmem:[%s1752_s1 + $0x48] sm:$0xff] (!%p170_p10)   ;;  %v1269_v8 = vld [vmem:[%s1752_s1 + $0x50] sm:$0xff] (!%p170_p10)   ;;  %p197_p11 = scmp.lt.s32.totalorder (!%p170_p10), %s1407_s15, 1  ;;  %vm933_vm1 = vcmask (!%p170_p10), 130048   ;;  %s1417_s10 = smov (!%p170_p10), [#allocation2]  }
   0xf   : > { %173 = sbr.rel (%p170_p10) target bundleno = 348 (0x15c), region = 32  ;;  %v1262_v1 = vld [vmem:[%s1752_s1 + $0xc0] sm:$0xff] (!%p170_p10)   ;;  %1118 = vmatprep.subr.bf16.mxu0 (!%p170_p10), %v1261_v0  ;;  %v1266_v5 = vld [vmem:[%s1752_s1 + $0xc8] sm:$0xff] (!%p170_p10)   ;;  %v1270_v9 = vld [vmem:[%s1752_s1 + $0xd0] sm:$0xff] (!%p170_p10)   ;;  %s1341_s18 = sshll.u32 (!%p170_p10), %s1417_s10, 4  ;;  %s1342_s18 = int_to_ptr.vmem [resolvable:$false] %s1341_s18 }
  0x10   : > { %v1263_v2 = vld [vmem:[%s1752_s1] sm:$0xff] (!%p170_p10)   ;;  %1140 = vmatprep.subr.bf16.mxu1 (!%p170_p10), %v1262_v1  ;;  %v1267_v6 = vld [vmem:[%s1752_s1 + $0x8] sm:$0xff] (!%p170_p10)   ;;  %v1271_v10 = vld [vmem:[%s1752_s1 + $0x10] sm:$0xff] (!%p170_p10)  }
  0x11   : > { %v1264_v3 = vld [vmem:[%s1752_s1 + $0x80] sm:$0xff] (!%p170_p10)   ;;  %1119 = vmatpush3.bf16.msra.mxu0 (!%p170_p10), %v1263_v2  ;;  %v1268_v7 = vld [vmem:[%s1752_s1 + $0x88] sm:$0xff] (!%p170_p10)   ;;  %v1272_v11 = vld [vmem:[%s1752_s1 + $0x90] sm:$0xff] (!%p170_p10)  }
  0x12   : > { %1141 = vmatpush3.bf16.msra.mxu1 (!%p170_p10), %v1264_v3  ;;  %1120 = vmatprep.subr.bf16.mxu0 (!%p170_p10), %v1265_v4  ;;  %v1273_v12 = vld [vmem:[%s1752_s1 + $0x58] sm:$0xff] (!%p170_p10)   ;;  %v1277_v16 = vld [vmem:[%s1752_s1 + $0x60] sm:$0xff] (!%p170_p10)   ;;  %v1281_v20 = vld [vmem:[%s1752_s1 + $0x68] sm:$0xff] (!%p170_p10)  }
  0x13   : > { %1142 = vmatprep.subr.bf16.mxu1 (!%p170_p10), %v1266_v5  ;;  %v1274_v13 = vld [vmem:[%s1752_s1 + $0xd8] sm:$0xff] (!%p170_p10)   ;;  %v1278_v17 = vld [vmem:[%s1752_s1 + $0xe0] sm:$0xff] (!%p170_p10)   ;;  %v1282_v21 = vld [vmem:[%s1752_s1 + $0xe8] sm:$0xff] (!%p170_p10)  }
  0x14   : > { %v1275_v14 = vld [vmem:[%s1752_s1 + $0x18] sm:$0xff] (!%p170_p10)   ;;  %v1279_v18 = vld [vmem:[%s1752_s1 + $0x20] sm:$0xff] (!%p170_p10)   ;;  %v1283_v22 = vld [vmem:[%s1752_s1 + $0x28] sm:$0xff] (!%p170_p10)  }
  0x15   : > { %1121 = vmatpush3.bf16.msra.mxu0 (!%p170_p10), %v1267_v6  ;;  %v1276_v15 = vld [vmem:[%s1752_s1 + $0x98] sm:$0xff] (!%p170_p10)   ;;  %v1280_v19 = vld [vmem:[%s1752_s1 + $0xa0] sm:$0xff] (!%p170_p10)   ;;  %v1284_v23 = vld [vmem:[%s1752_s1 + $0xa8] sm:$0xff] (!%p170_p10)  }
  0x16   : > { %1143 = vmatpush3.bf16.msra.mxu1 %v1268_v7  ;;  %1122 = vmatprep.subr.bf16.mxu0 %v1269_v8  ;;  %s198_s11 = scalar_select %p197_p11, %s1407_s15, 1  ;;  %v1285_v24 = vld [vmem:[%s1752_s1 + $0x70] sm:$0xff]   ;;  %v1289_v28 = vld [vmem:[%s1752_s1 + $0x78] sm:$0xff]   ;;  %v1297_v38 = vld [vmem:[%s1752_s1 + $0x140] sm:$0xff]  }
  0x17   : > { %1144 = vmatprep.subr.bf16.mxu1 %v1270_v9  ;;  %v1286_v25 = vld [vmem:[%s1752_s1 + $0xf0] sm:$0xff]   ;;  %v1290_v29 = vld [vmem:[%s1752_s1 + $0xf8] sm:$0xff]   ;;  %v1298_v39 = vld [vmem:[%s1752_s1 + $0x1c0] sm:$0xff]  }
  0x18   : > { %v1287_v26 = vld [vmem:[%s1752_s1 + $0x30] sm:$0xff]   ;;  %s1117_s30 = sshll.u32 %s198_s11, 5  ;;  %v1291_v30 = vld [vmem:[%s1752_s1 + $0x38] sm:$0xff]   ;;  %v1299_v40 = vld [vmem:[%s1752_s1 + $0x100] sm:$0xff]   ;;  %s1343_s11 = scalar_lea.vmem %s1342_s18, 256 }
  0x19   : > { %1123 = vmatpush3.bf16.msra.mxu0 %v1271_v10  ;;  %v1288_v27 = vld [vmem:[%s1752_s1 + $0xb0] sm:$0xff]   ;;  %s1588_s19 = scalar_lea.vmem %s1751_s0, %s1117_s30  ;;  %v1292_v31 = vld [vmem:[%s1752_s1 + $0xb8] sm:$0xff]   ;;  %v1300_v41 = vld [vmem:[%s1752_s1 + $0x180] sm:$0xff]   ;;  %s1114_s30 = sshll.u32 %s1407_s15, 7 }
  0x1a   : > { %1145 = vmatpush3.bf16.msra.mxu1 %v1272_v11  ;;  %1124 = vmatprep.subr.bf16.mxu0 %v1273_v12  ;;  %v207_v32 = vld [vmem:[%s1588_s19] sm:$0xff]  ;;  %v208_v33 = vld [vmem:[%s1588_s19 + $0x8] sm:$0xff]  ;;  %v1305_v46 = vld [vmem:[%s1752_s1 + $0x150] sm:$0xff]   ;;  %s1704_s8 = scalar_lea.hbm %s1754_s3, %s1114_s30 }
  0x1b   : > { %1146 = vmatprep.subr.bf16.mxu1 %v1274_v13  ;;  %v1041_v34 = vcombine.low %v207_v32, %v207_v32  ;;  %v1042_v35 = vcombine.high %v207_v32, %v207_v32  ;;  %v1043_v36 = vcombine.low %v208_v33, %v208_v33  ;;  %v1044_v37 = vcombine.high %v208_v33, %v208_v33  ;;  %v1301_v42 = vld [vmem:[%s1752_s1 + $0x148] sm:$0xff]   ;;  %v1306_v47 = vld [vmem:[%s1752_s1 + $0x1d0] sm:$0xff]   ;;  %v1309_v50 = vld [vmem:[%s1752_s1 + $0x158] sm:$0xff]  }
  0x1c   : > { %v1302_v43 = vld [vmem:[%s1752_s1 + $0x1c8] sm:$0xff]   ;;  %v1307_v48 = vld [vmem:[%s1752_s1 + $0x110] sm:$0xff]   ;;  %v1310_v51 = vld [vmem:[%s1752_s1 + $0x1d8] sm:$0xff]  }
  0x1d   : > { %1125 = vmatpush3.bf16.msra.mxu0 %v1275_v14  ;;  %790 = vmatprep.mubr.bf16.mxu0 %v1042_v35  ;;  %v1303_v44 = vld [vmem:[%s1752_s1 + $0x108] sm:$0xff]   ;;  %v1308_v49 = vld [vmem:[%s1752_s1 + $0x190] sm:$0xff]   ;;  %v1311_v52 = vld [vmem:[%s1752_s1 + $0x118] sm:$0xff]  }
  0x1e   : > { %1147 = vmatpush3.bf16.msra.mxu1 %v1276_v15  ;;  %1126 = vmatprep.subr.bf16.mxu0 %v1277_v16  ;;  %v1304_v45 = vld [vmem:[%s1752_s1 + $0x188] sm:$0xff]   ;;  %v1312_v53 = vld [vmem:[%s1752_s1 + $0x198] sm:$0xff]   ;;  %v1313_v54 = vld [vmem:[%s1752_s1 + $0x160] sm:$0xff]  }
  0x1f   : > { %1148 = vmatprep.subr.bf16.mxu1 %v1278_v17  ;;  %830 = vmatprep.mubr.bf16.mxu1 %v1044_v37  ;;  %v1314_v55 = vld [vmem:[%s1752_s1 + $0x1e0] sm:$0xff]   ;;  %v1317_v58 = vld [vmem:[%s1752_s1 + $0x168] sm:$0xff]   ;;  %v1321_v62 = vld [vmem:[%s1752_s1 + $0x170] sm:$0xff]  }
  0x20   : > { %v1315_v56 = vld [vmem:[%s1752_s1 + $0x120] sm:$0xff]   ;;  %v1318_v59 = vld [vmem:[%s1752_s1 + $0x1e8] sm:$0xff]   ;;  %v1322_v63 = vld [vmem:[%s1752_s1 + $0x1f0] sm:$0xff]  }
  0x21   : > { %1127 = vmatpush3.bf16.msra.mxu0 %v1279_v18  ;;  %v1316_v57 = vld [vmem:[%s1752_s1 + $0x1a0] sm:$0xff]   ;;  %v1319_v60 = vld [vmem:[%s1752_s1 + $0x128] sm:$0xff]   ;;  %v1323_v0 = vld [vmem:[%s1752_s1 + $0x130] sm:$0xff]  }
  0x22   : > { %1149 = vmatpush3.bf16.msra.mxu1 %v1280_v19  ;;  %1128 = vmatprep.subr.bf16.mxu0 %v1281_v20  ;;  %v1320_v61 = vld [vmem:[%s1752_s1 + $0x1a8] sm:$0xff]   ;;  %v1324_v1 = vld [vmem:[%s1752_s1 + $0x1b0] sm:$0xff]   ;;  %v1325_v2 = vld [vmem:[%s1752_s1 + $0x178] sm:$0xff]  }
  0x23   : > { %1150 = vmatprep.subr.bf16.mxu1 %v1282_v21  ;;  %v1326_v3 = vld [vmem:[%s1752_s1 + $0x1f8] sm:$0xff]   ;;  %v209_v6 = vld [vmem:[%s1588_s19 + $0x10] sm:$0xff]  ;;  %v1040_v14 = vld [vmem:[%s1753_s2] ss:$0 sm:$0xff] }
  0x24   : > { %v1327_v4 = vld [vmem:[%s1752_s1 + $0x138] sm:$0xff]   ;;  %v1045_v7 = vcombine.low %v209_v6, %v209_v6  ;;  %v1046_v8 = vcombine.high %v209_v6, %v209_v6 }
  0x25   : > { %1129 = vmatpush3.bf16.msra.mxu0 %v1283_v22  ;;  %v1328_v5 = vld [vmem:[%s1752_s1 + $0x1b8] sm:$0xff]  }
  0x26   : > { %1151 = vmatpush3.bf16.msra.mxu1 %v1284_v23  ;;  %1130 = vmatprep.subr.bf16.mxu0 %v1285_v24  ;;  %v210_v9 = vld [vmem:[%s1588_s19 + $0x18] sm:$0xff]  ;;  %s194_s19 = sand.u32 1, %s1399_s13  }
  0x27   : > { %1152 = vmatprep.subr.bf16.mxu1 %v1286_v25  ;;  %v1047_v10 = vcombine.low %v210_v9, %v210_v9  ;;  %v1048_v11 = vcombine.high %v210_v9, %v210_v9  ;;  %s1037_s29 = sshll.u32 %s194_s19, 3  ;;  %s936_s9 = scalar_lea.sflag [#allocation3], %s194_s19 }
  0x28   : > { %s196_s4 = scalar_lea.vmem [#allocation2], %s1037_s29 }
  0x29   : > { %1131 = vmatpush3.bf16.msra.mxu0 %v1287_v26  ;;  %s951_s5 = sshll.u32 %s196_s4, 4  ;;  %s1706_s5 = int_to_ptr.vmem [resolvable:$true] %s951_s5 }
  0x2a   : > { %1153 = vmatpush3.bf16.msra.mxu1 %v1288_v27  ;;  %1132 = vmatprep.subr.bf16.mxu0 %v1289_v28  ;;  %s1337_s15 = scalar_lea.vmem %s1706_s5, 128  ;;  %p1344_p1 = scmp.lt.s32.totalorder %s1706_s5, %s1342_s18 }
  0x2b   : > { %1154 = vmatprep.subr.bf16.mxu1 %v1290_v29  ;;  %p1338_p12 = scmp.ne.s32.totalorder %s1706_s5, %s1337_s15  ;;  %p1345_p2 = scmp.lt.s32.totalorder %s1343_s11, %s1337_s15 }
  0x2d   : > { %1133 = vmatpush3.bf16.msra.mxu0 %v1291_v30  ;;  %p1339_p13 = pnand %p1338_p12, %p1478_p4  ;;  %p1346_p3 = por %p1345_p2, %p1344_p1 }
  0x2e   : > { %1155 = vmatpush3.bf16.msra.mxu1 %v1292_v31  ;;  %1162 = vmatprep.subr.bf16.mxu0 %v1297_v38 }
  0x2f   : > { %1184 = vmatprep.subr.bf16.mxu1 %v1298_v39  ;;  %p1340_p0 = pneg %p1339_p13 }
  0x30   : > { %791 = vmatmul.mubr.bf16.vlgmr.msra.gmra.mrb[0].mxu0 %v1041_v34 }
  0x31   : > { %831 = vmatmul.mubr.bf16.vlgmr.msra.gmra.mrb[0].mxu1 %v1043_v36  ;;  %1163 = vmatpush3.bf16.msra.mxu0 %v1299_v40  ;;  %p1347_p5 = pnand %p1346_p3, %p1340_p0 }
  0x32   : > { %1185 = vmatpush3.bf16.msra.mxu1 %v1300_v41  ;;  %1164 = vmatprep.subr.bf16.mxu0 %v1301_v42 }
  0x33   : > { %1186 = vmatprep.subr.bf16.mxu1 %v1302_v43  ;;  %870 = vmatprep.mubr.bf16.mxu0 %v1046_v8 }
  0x34   : > { %910 = vmatprep.mubr.bf16.mxu1 %v1048_v11 }
  0x35   : > { %1165 = vmatpush3.bf16.msra.mxu0 %v1303_v44 }
  0x36   : > { %1187 = vmatpush3.bf16.msra.mxu1 %v1304_v45  ;;  %1166 = vmatprep.subr.bf16.mxu0 %v1305_v46 }
  0x37   : > { %1188 = vmatprep.subr.bf16.mxu1 %v1306_v47 }
  0x39   : > { %1167 = vmatpush3.bf16.msra.mxu0 %v1307_v48 }
  0x3a   : > { %1189 = vmatpush3.bf16.msra.mxu1 %v1308_v49  ;;  %1168 = vmatprep.subr.bf16.mxu0 %v1309_v50 }
  0x3b   : > { %1190 = vmatprep.subr.bf16.mxu1 %v1310_v51 }
  0x3d   : > { %1169 = vmatpush3.bf16.msra.mxu0 %v1311_v52 }
  0x3e   : > { %1191 = vmatpush3.bf16.msra.mxu1 %v1312_v53  ;;  %1170 = vmatprep.subr.bf16.mxu0 %v1313_v54 }
  0x3f   : > { %1192 = vmatprep.subr.bf16.mxu1 %v1314_v55 }
  0x41   : > { %1171 = vmatpush3.bf16.msra.mxu0 %v1315_v56 }
  0x42   : > { %1193 = vmatpush3.bf16.msra.mxu1 %v1316_v57  ;;  %1172 = vmatprep.subr.bf16.mxu0 %v1317_v58 }
  0x43   : > { %1194 = vmatprep.subr.bf16.mxu1 %v1318_v59 }
  0x45   : > { %1173 = vmatpush3.bf16.msra.mxu0 %v1319_v60 }
  0x46   : > { %1195 = vmatpush3.bf16.msra.mxu1 %v1320_v61  ;;  %1174 = vmatprep.subr.bf16.mxu0 %v1321_v62 }
  0x47   : > { %1196 = vmatprep.subr.bf16.mxu1 %v1322_v63 }
  0x49   : > { %1175 = vmatpush3.bf16.msra.mxu0 %v1323_v0 }
  0x4a   : > { %1197 = vmatpush3.bf16.msra.mxu1 %v1324_v1  ;;  %1176 = vmatprep.subr.bf16.mxu0 %v1325_v2 }
  0x4b   : > { %1198 = vmatprep.subr.bf16.mxu1 %v1326_v3 }
  0x4d   : > { %1177 = vmatpush3.bf16.msra.mxu0 %v1327_v4 }
  0x4e   : > { %1199 = vmatpush3.bf16.msra.mxu1 %v1328_v5 }
  0x50   : > { %871 = vmatmul.mubr.bf16.vlgmr.msra.gmra.mrb[4].mxu0 %v1045_v7 }
  0x51   : > { %911 = vmatmul.mubr.bf16.vlgmr.msra.gmra.mrb[4].mxu1 %v1047_v10 }
 0x103   : > { %v1134_v12 = vpop.f32.mrb[0].mxu0 }
 0x104   : > { %v1156_v13 = vpop.f32.mrb[0].mxu1  ;;  %v1135_v15 = vpop.f32.mrb[1].mxu0 }
 0x105   : > { %v1157_v16 = vpop.f32.mrb[1].mxu1  ;;  %v1136_v17 = vadd.f32 %v1135_v15, %v1134_v12  ;;  %v1137_v19 = vpop.f32.mrb[2].mxu0 }
 0x106   : > { %v1158_v18 = vadd.f32 %v1157_v16, %v1156_v13  ;;  %v1159_v20 = vpop.f32.mrb[2].mxu1  ;;  %v1138_v21 = vpop.f32.mrb[3].mxu0 }
 0x107   : > { %v1160_v22 = vpop.f32.mrb[3].mxu1  ;;  %v793_v23 = vadd.f32 %v1136_v17, %v1040_v14 }
 0x109   : > { %v833_v24 = vadd.f32 %v1158_v18, %v793_v23 }
 0x123   : > { %v1178_v25 = vpop.f32.mrb[4].mxu0 }
 0x124   : > { %v1200_v26 = vpop.f32.mrb[4].mxu1  ;;  %v1179_v27 = vpop.f32.mrb[5].mxu0 }
 0x125   : > { %v1201_v28 = vpop.f32.mrb[5].mxu1  ;;  %v1180_v29 = vadd.f32 %v1179_v27, %v1178_v25  ;;  %v1181_v31 = vpop.f32.mrb[6].mxu0 }
 0x126   : > { %v1202_v30 = vadd.f32 %v1201_v28, %v1200_v26  ;;  %v1203_v32 = vpop.f32.mrb[6].mxu1  ;;  %v1182_v33 = vpop.f32.mrb[7].mxu0 }
 0x127   : > { %v1204_v34 = vpop.f32.mrb[7].mxu1  ;;  %v873_v35 = vadd.f32 %v1180_v29, %v833_v24 }
 0x129   : > { %v913_v36 = vadd.f32 %v1202_v30, %v873_v35 }
 0x12b   : > { %v919_v37 = vand.u32 2147483647, %v913_v36  ;;  %v918_v48 = vmax.f32 %v913_v36, 0.0 }
 0x12d   : > { %v920_v38 = vsub.f32 0.0, %v919_v37 }
 0x12f   : > { %v921_v39 = vmul.f32 1.442695, %v920_v38 }
 0x131   : > { %1333 = vpow2.f32 %v921_v39 }
 0x13b   : > { %v1334_v40 = vpop.eup %1333 }
 0x13c   : > { %v923_v41 = vadd.f32 1.0, %v1334_v40  ;;  %v926_v42 = vmul.f32 -0.5, %v1334_v40  ;;  %v929_v44 = vand.u32 2147483647, %v1334_v40 }
 0x13e   : > { %1335 = vlog2.f32 %v923_v41  ;;  %v927_v43 = vadd.f32 1.0, %v926_v42  ;;  %vm930_vm0 = vcmp.lt.f32.partialorder %v929_v44, 0.0004427343 }
 0x140   : > { %v928_v47 = vmul.f32 %v1334_v40, %v927_v43 }
 0x148   : > { %v1336_v45 = vpop.eup %1335 }
 0x149   : > { %v925_v46 = vmul.f32 0.6931472, %v1336_v45 }
 0x14b   : > { %v931_v49 = vsel %vm930_vm0, %v928_v47, %v925_v46 }
 0x14c   : > { %v932_v50 = vadd.f32 %v931_v49, %v918_v48 }
 0x14e   : > { %934 = vst.msk [vmem:[%s196_s4] sm:$0xff] %vm933_vm1, %v932_v50 }
 0x14f   : > { %1350 = shalt.err (!%p1347_p5)
}
 0x150   : > { %s1351_s21 = scalar_lea.hbm %s1704_s8, 128  ;;  %s1355_s27 = scalar_lea.hbm %s1754_s3, 256 }
 0x151   : > { %p1352_p6 = scmp.ne.s32.totalorder %s1704_s8, %s1351_s21  ;;  %p1356_p10 = scmp.lt.u32.totalorder %s1704_s8, %s1754_s3 }
 0x152   : > { %p1357_p11 = scmp.lt.u32.totalorder %s1355_s27, %s1351_s21  ;;  %p1359_p13 = scmp.lt.u32.totalorder %s1351_s21, %s1704_s8 }
 0x153   : > { %p1353_p7 = pnand %p1352_p6, %p1478_p4 }
 0x154   : > { %p1358_p12 = por %p1357_p11, %p1356_p10 }
 0x155   : > { %p1354_p9 = pneg %p1353_p7 }
 0x156   : > { %p1360_p0 = por %p1359_p13, %p1358_p12 }
 0x158   : > { %p1361_p1 = pnand %p1360_p0, %p1354_p9 }
 0x15a   : > { %1364 = shalt.err (!%p1361_p1)
}
 0x15b   : > { %1206 = dma.vmem_to_hbm [thread:$0]  (%p1478_p4), %s1706_s5, 128, %s1704_s8, %s936_s9  }
 0x15c PF: > { %p1212_p2 = scmp.ge.s32.totalorder %s1415_s17, 2  ;;  %s963_s29 = sand.u32 1, %s1395_s12  }
 0x15d   : > { %s964_s30 = scalar_lea.sflag [#allocation3], %s963_s29 }
 0x15e   : > { %p1209_p3 = pnand %p1212_p2, %p1485_p8 }
 0x160   : > { %1390 = dma.done.wait (!%p1209_p3), %s964_s30, 128  }
 0x161   : > { %1392 = vsyncadd (!%p1209_p3), %s964_s30, 4294967168  ;;  %s16_s17 = sadd.s32 1, %s1415_s17   ;;  %s1757_s12 = smov %s1399_s13 }
 0x162   : > { %p13_p5 = scmp.ge.s32.totalorder %s16_s17, 4   ;;  %s1758_s13 = smov %s1403_s14 }
 0x163   : > { %s1759_s14 = smov %s1491_s25  ;;  %s1760_s15 = smov %s1411_s16 }
 0x164   : > { %s1761_s16 = smov %s1763_s20  ;;  %15 = sbr.rel (!%p13_p5) target bundleno = 4 (0x4), region = 67 }
 0x16b   :  { %969 = vsyncpa [#allocation3], 1 }
 0x16c   :  { %971 = vsyncpa [#allocation3 + $0x1], 1 }

// kernel: tpu_custom_call.1
= control target key start
LH: loop header
LB: loop body
LE: loop exit
PB: predicated region body
PF: predicated region fallthrough
CT: control target
= control target key end

     0   :  { %8 = vsyncpa [#allocation3], 0  ;;  %s1751_s0 = inlined_call_operand.vmem [shape: bf16[2,8,1024], index: 0, kind: input, shape index: {}]   ;;  %s1752_s1 = inlined_call_operand.vmem [shape: bf16[1024,16], index: 1, kind: input, shape index: {}]   ;;  %s1753_s2 = inlined_call_operand.vmem [shape: f32[1,16], index: 2, kind: input, shape index: {}]   ;;  %s1754_s3 = inlined_call_operand.hbm [shape: f32[2,8,16], index: 3, kind: output, shape index: {}]  }
   0x1   :  { %10 = vsyncpa [#allocation3 + $0x1], 0  ;;  %s1438_s12 = smov 0   ;;  %s1440_s13 = smov 0  }
   0x2   :  { %s1442_s14 = smov 0   ;;  %s1444_s15 = smov 0  }
   0x3   :  { %s1446_s16 = smov 0   ;;  %s1448_s17 = smov 0  }
   0x4 LB: > { %s1032_s18 = sadd.s32 4294967295, %s1415_s17   ;;  %s1033_s19 = sadd.s32 4294967294, %s1415_s17   ;;  %s1415_s17 = sphi %s1448_s17, %s16_s17   ;;  %s1411_s16 = sphi %s1446_s16, %s1761_s16   ;;  %s1407_s15 = sphi %s1444_s15, %s1760_s15   ;;  %s1403_s14 = sphi %s1442_s14, %s1759_s14   ;;  %s1399_s13 = sphi %s1440_s13, %s1758_s13   ;;  %s1395_s12 = sphi %s1438_s12, %s1757_s12  }
   0x5   : > { %s35_s20 = sadd.s32 1, %s1411_s16  ;;  %s116_s21 = sadd.s32 1, %s1403_s14 }
   0x6   : > { %p37_p0 = scmp.ge.s32.totalorder %s35_s20, 2  ;;  %p126_p1 = scmp.ne.s32.totalorder %s1403_s14, %s1399_s13 }
   0x7   : > { %p127_p2 = scmp.eq.s32.totalorder %s1032_s18, 1  ;;  %p132_p3 = scmp.ne.s32.totalorder %s1399_s13, %s1395_s12 }
   0x8   : > { %s1763_s20 = smov (%p37_p0, %s35_s20), 0  ;;  %p133_p5 = scmp.eq.s32.totalorder %s1033_s19, 1 }
   0x9   : > { %p1478_p4 = por %p127_p2, %p126_p1  ;;  %s109_s23 = ssub.s32 %s1411_s16, %s1763_s20 }
   0xa   : > { %p1036_p6 = scmp.ge.s32.totalorder %s1415_s17, 1  ;;  %p114_p7 = scmp.eq.s32.totalorder %s109_s23, 0 }
   0xb   : > { %p1485_p8 = por %p133_p5, %p132_p3  ;;  %p169_p9 = scmp.lt.s32.totalorder %s1415_s17, 3 }
   0xc   : > { %s1491_s25 = scalar_select %p114_p7, %s1403_s14, %s116_s21  }
   0xd   : > { %p170_p10 = pnand %p1036_p6, %p169_p9 }
   0xe   : > { %v1261_v0 = vld [vmem:[%s1752_s1 + $0x40] sm:$0xff] (!%p170_p10)   ;;  %v1265_v4 = vld [vmem:[%s1752_s1 + $0x48] sm:$0xff] (!%p170_p10)   ;;  %v1269_v8 = vld [vmem:[%s1752_s1 + $0x50] sm:$0xff] (!%p170_p10)   ;;  %p197_p11 = scmp.lt.s32.totalorder (!%p170_p10), %s1407_s15, 1  ;;  %vm933_vm1 = vcmask (!%p170_p10), 130048   ;;  %s1417_s10 = smov (!%p170_p10), [#allocation2]  }
   0xf   : > { %173 = sbr.rel (%p170_p10) target bundleno = 348 (0x15c), region = 32  ;;  %v1262_v1 = vld [vmem:[%s1752_s1 + $0xc0] sm:$0xff] (!%p170_p10)   ;;  %1118 = vmatprep.subr.bf16.mxu0 (!%p170_p10), %v1261_v0  ;;  %v1266_v5 = vld [vmem:[%s1752_s1 + $0xc8] sm:$0xff] (!%p170_p10)   ;;  %v1270_v9 = vld [vmem:[%s1752_s1 + $0xd0] sm:$0xff] (!%p170_p10)   ;;  %s1341_s18 = sshll.u32 (!%p170_p10), %s1417_s10, 4  ;;  %s1342_s18 = int_to_ptr.vmem [resolvable:$false] %s1341_s18 }
  0x10   : > { %v1263_v2 = vld [vmem:[%s1752_s1] sm:$0xff] (!%p170_p10)   ;;  %1140 = vmatprep.subr.bf16.mxu1 (!%p170_p10), %v1262_v1  ;;  %v1267_v6 = vld [vmem:[%s1752_s1 + $0x8] sm:$0xff] (!%p170_p10)   ;;  %v1271_v10 = vld [vmem:[%s1752_s1 + $0x10] sm:$0xff] (!%p170_p10)  }
  0x11   : > { %v1264_v3 = vld [vmem:[%s1752_s1 + $0x80] sm:$0xff] (!%p170_p10)   ;;  %1119 = vmatpush3.bf16.msra.mxu0 (!%p170_p10), %v1263_v2  ;;  %v1268_v7 = vld [vmem:[%s1752_s1 + $0x88] sm:$0xff] (!%p170_p10)   ;;  %v1272_v11 = vld [vmem:[%s1752_s1 + $0x90] sm:$0xff] (!%p170_p10)  }
  0x12   : > { %1141 = vmatpush3.bf16.msra.mxu1 (!%p170_p10), %v1264_v3  ;;  %1120 = vmatprep.subr.bf16.mxu0 (!%p170_p10), %v1265_v4  ;;  %v1273_v12 = vld [vmem:[%s1752_s1 + $0x58] sm:$0xff] (!%p170_p10)   ;;  %v1277_v16 = vld [vmem:[%s1752_s1 + $0x60] sm:$0xff] (!%p170_p10)   ;;  %v1281_v20 = vld [vmem:[%s1752_s1 + $0x68] sm:$0xff] (!%p170_p10)  }
  0x13   : > { %1142 = vmatprep.subr.bf16.mxu1 (!%p170_p10), %v1266_v5  ;;  %v1274_v13 = vld [vmem:[%s1752_s1 + $0xd8] sm:$0xff] (!%p170_p10)   ;;  %v1278_v17 = vld [vmem:[%s1752_s1 + $0xe0] sm:$0xff] (!%p170_p10)   ;;  %v1282_v21 = vld [vmem:[%s1752_s1 + $0xe8] sm:$0xff] (!%p170_p10)  }
  0x14   : > { %v1275_v14 = vld [vmem:[%s1752_s1 + $0x18] sm:$0xff] (!%p170_p10)   ;;  %v1279_v18 = vld [vmem:[%s1752_s1 + $0x20] sm:$0xff] (!%p170_p10)   ;;  %v1283_v22 = vld [vmem:[%s1752_s1 + $0x28] sm:$0xff] (!%p170_p10)  }
  0x15   : > { %1121 = vmatpush3.bf16.msra.mxu0 (!%p170_p10), %v1267_v6  ;;  %v1276_v15 = vld [vmem:[%s1752_s1 + $0x98] sm:$0xff] (!%p170_p10)   ;;  %v1280_v19 = vld [vmem:[%s1752_s1 + $0xa0] sm:$0xff] (!%p170_p10)   ;;  %v1284_v23 = vld [vmem:[%s1752_s1 + $0xa8] sm:$0xff] (!%p170_p10)  }
  0x16   : > { %1143 = vmatpush3.bf16.msra.mxu1 %v1268_v7  ;;  %1122 = vmatprep.subr.bf16.mxu0 %v1269_v8  ;;  %s198_s11 = scalar_select %p197_p11, %s1407_s15, 1  ;;  %v1285_v24 = vld [vmem:[%s1752_s1 + $0x70] sm:$0xff]   ;;  %v1289_v28 = vld [vmem:[%s1752_s1 + $0x78] sm:$0xff]   ;;  %v1297_v38 = vld [vmem:[%s1752_s1 + $0x140] sm:$0xff]  }
  0x17   : > { %1144 = vmatprep.subr.bf16.mxu1 %v1270_v9  ;;  %v1286_v25 = vld [vmem:[%s1752_s1 + $0xf0] sm:$0xff]   ;;  %v1290_v29 = vld [vmem:[%s1752_s1 + $0xf8] sm:$0xff]   ;;  %v1298_v39 = vld [vmem:[%s1752_s1 + $0x1c0] sm:$0xff]  }
  0x18   : > { %v1287_v26 = vld [vmem:[%s1752_s1 + $0x30] sm:$0xff]   ;;  %s1117_s30 = sshll.u32 %s198_s11, 5  ;;  %v1291_v30 = vld [vmem:[%s1752_s1 + $0x38] sm:$0xff]   ;;  %v1299_v40 = vld [vmem:[%s1752_s1 + $0x100] sm:$0xff]   ;;  %s1343_s11 = scalar_lea.vmem %s1342_s18, 256 }
  0x19   : > { %1123 = vmatpush3.bf16.msra.mxu0 %v1271_v10  ;;  %v1288_v27 = vld [vmem:[%s1752_s1 + $0xb0] sm:$0xff]   ;;  %s1588_s19 = scalar_lea.vmem %s1751_s0, %s1117_s30  ;;  %v1292_v31 = vld [vmem:[%s1752_s1 + $0xb8] sm:$0xff]   ;;  %v1300_v41 = vld [vmem:[%s1752_s1 + $0x180] sm:$0xff]   ;;  %s1114_s30 = sshll.u32 %s1407_s15, 7 }
  0x1a   : > { %1145 = vmatpush3.bf16.msra.mxu1 %v1272_v11  ;;  %1124 = vmatprep.subr.bf16.mxu0 %v1273_v12  ;;  %v207_v32 = vld [vmem:[%s1588_s19] sm:$0xff]  ;;  %v208_v33 = vld [vmem:[%s1588_s19 + $0x8] sm:$0xff]  ;;  %v1305_v46 = vld [vmem:[%s1752_s1 + $0x150] sm:$0xff]   ;;  %s1704_s8 = scalar_lea.hbm %s1754_s3, %s1114_s30 }
  0x1b   : > { %1146 = vmatprep.subr.bf16.mxu1 %v1274_v13  ;;  %v1041_v34 = vcombine.low %v207_v32, %v207_v32  ;;  %v1042_v35 = vcombine.high %v207_v32, %v207_v32  ;;  %v1043_v36 = vcombine.low %v208_v33, %v208_v33  ;;  %v1044_v37 = vcombine.high %v208_v33, %v208_v33  ;;  %v1301_v42 = vld [vmem:[%s1752_s1 + $0x148] sm:$0xff]   ;;  %v1306_v47 = vld [vmem:[%s1752_s1 + $0x1d0] sm:$0xff]   ;;  %v1309_v50 = vld [vmem:[%s1752_s1 + $0x158] sm:$0xff]  }
  0x1c   : > { %v1302_v43 = vld [vmem:[%s1752_s1 + $0x1c8] sm:$0xff]   ;;  %v1307_v48 = vld [vmem:[%s1752_s1 + $0x110] sm:$0xff]   ;;  %v1310_v51 = vld [vmem:[%s1752_s1 + $0x1d8] sm:$0xff]  }
  0x1d   : > { %1125 = vmatpush3.bf16.msra.mxu0 %v1275_v14  ;;  %790 = vmatprep.mubr.bf16.mxu0 %v1042_v35  ;;  %v1303_v44 = vld [vmem:[%s1752_s1 + $0x108] sm:$0xff]   ;;  %v1308_v49 = vld [vmem:[%s1752_s1 + $0x190] sm:$0xff]   ;;  %v1311_v52 = vld [vmem:[%s1752_s1 + $0x118] sm:$0xff]  }
  0x1e   : > { %1147 = vmatpush3.bf16.msra.mxu1 %v1276_v15  ;;  %1126 = vmatprep.subr.bf16.mxu0 %v1277_v16  ;;  %v1304_v45 = vld [vmem:[%s1752_s1 + $0x188] sm:$0xff]   ;;  %v1312_v53 = vld [vmem:[%s1752_s1 + $0x198] sm:$0xff]   ;;  %v1313_v54 = vld [vmem:[%s1752_s1 + $0x160] sm:$0xff]  }
  0x1f   : > { %1148 = vmatprep.subr.bf16.mxu1 %v1278_v17  ;;  %830 = vmatprep.mubr.bf16.mxu1 %v1044_v37  ;;  %v1314_v55 = vld [vmem:[%s1752_s1 + $0x1e0] sm:$0xff]   ;;  %v1317_v58 = vld [vmem:[%s1752_s1 + $0x168] sm:$0xff]   ;;  %v1321_v62 = vld [vmem:[%s1752_s1 + $0x170] sm:$0xff]  }
  0x20   : > { %v1315_v56 = vld [vmem:[%s1752_s1 + $0x120] sm:$0xff]   ;;  %v1318_v59 = vld [vmem:[%s1752_s1 + $0x1e8] sm:$0xff]   ;;  %v1322_v63 = vld [vmem:[%s1752_s1 + $0x1f0] sm:$0xff]  }
  0x21   : > { %1127 = vmatpush3.bf16.msra.mxu0 %v1279_v18  ;;  %v1316_v57 = vld [vmem:[%s1752_s1 + $0x1a0] sm:$0xff]   ;;  %v1319_v60 = vld [vmem:[%s1752_s1 + $0x128] sm:$0xff]   ;;  %v1323_v0 = vld [vmem:[%s1752_s1 + $0x130] sm:$0xff]  }
  0x22   : > { %1149 = vmatpush3.bf16.msra.mxu1 %v1280_v19  ;;  %1128 = vmatprep.subr.bf16.mxu0 %v1281_v20  ;;  %v1320_v61 = vld [vmem:[%s1752_s1 + $0x1a8] sm:$0xff]   ;;  %v1324_v1 = vld [vmem:[%s1752_s1 + $0x1b0] sm:$0xff]   ;;  %v1325_v2 = vld [vmem:[%s1752_s1 + $0x178] sm:$0xff]  }
  0x23   : > { %1150 = vmatprep.subr.bf16.mxu1 %v1282_v21  ;;  %v1326_v3 = vld [vmem:[%s1752_s1 + $0x1f8] sm:$0xff]   ;;  %v209_v6 = vld [vmem:[%s1588_s19 + $0x10] sm:$0xff]  ;;  %v1040_v14 = vld [vmem:[%s1753_s2] ss:$0 sm:$0xff] }
  0x24   : > { %v1327_v4 = vld [vmem:[%s1752_s1 + $0x138] sm:$0xff]   ;;  %v1045_v7 = vcombine.low %v209_v6, %v209_v6  ;;  %v1046_v8 = vcombine.high %v209_v6, %v209_v6 }
  0x25   : > { %1129 = vmatpush3.bf16.msra.mxu0 %v1283_v22  ;;  %v1328_v5 = vld [vmem:[%s1752_s1 + $0x1b8] sm:$0xff]  }
  0x26   : > { %1151 = vmatpush3.bf16.msra.mxu1 %v1284_v23  ;;  %1130 = vmatprep.subr.bf16.mxu0 %v1285_v24  ;;  %v210_v9 = vld [vmem:[%s1588_s19 + $0x18] sm:$0xff]  ;;  %s194_s19 = sand.u32 1, %s1399_s13  }
  0x27   : > { %1152 = vmatprep.subr.bf16.mxu1 %v1286_v25  ;;  %v1047_v10 = vcombine.low %v210_v9, %v210_v9  ;;  %v1048_v11 = vcombine.high %v210_v9, %v210_v9  ;;  %s1037_s29 = sshll.u32 %s194_s19, 3  ;;  %s936_s9 = scalar_lea.sflag [#allocation3], %s194_s19 }
  0x28   : > { %s196_s4 = scalar_lea.vmem [#allocation2], %s1037_s29 }
  0x29   : > { %1131 = vmatpush3.bf16.msra.mxu0 %v1287_v26  ;;  %s951_s5 = sshll.u32 %s196_s4, 4  ;;  %s1706_s5 = int_to_ptr.vmem [resolvable:$true] %s951_s5 }
  0x2a   : > { %1153 = vmatpush3.bf16.msra.mxu1 %v1288_v27  ;;  %1132 = vmatprep.subr.bf16.mxu0 %v1289_v28  ;;  %s1337_s15 = scalar_lea.vmem %s1706_s5, 128  ;;  %p1344_p1 = scmp.lt.s32.totalorder %s1706_s5, %s1342_s18 }
  0x2b   : > { %1154 = vmatprep.subr.bf16.mxu1 %v1290_v29  ;;  %p1338_p12 = scmp.ne.s32.totalorder %s1706_s5, %s1337_s15  ;;  %p1345_p2 = scmp.lt.s32.totalorder %s1343_s11, %s1337_s15 }
  0x2d   : > { %1133 = vmatpush3.bf16.msra.mxu0 %v1291_v30  ;;  %p1339_p13 = pnand %p1338_p12, %p1478_p4  ;;  %p1346_p3 = por %p1345_p2, %p1344_p1 }
  0x2e   : > { %1155 = vmatpush3.bf16.msra.mxu1 %v1292_v31  ;;  %1162 = vmatprep.subr.bf16.mxu0 %v1297_v38 }
  0x2f   : > { %1184 = vmatprep.subr.bf16.mxu1 %v1298_v39  ;;  %p1340_p0 = pneg %p1339_p13 }
  0x30   : > { %791 = vmatmul.mubr.bf16.vlgmr.msra.gmra.mrb[0].mxu0 %v1041_v34 }
  0x31   : > { %831 = vmatmul.mubr.bf16.vlgmr.msra.gmra.mrb[0].mxu1 %v1043_v36  ;;  %1163 = vmatpush3.bf16.msra.mxu0 %v1299_v40  ;;  %p1347_p5 = pnand %p1346_p3, %p1340_p0 }
  0x32   : > { %1185 = vmatpush3.bf16.msra.mxu1 %v1300_v41  ;;  %1164 = vmatprep.subr.bf16.mxu0 %v1301_v42 }
  0x33   : > { %1186 = vmatprep.subr.bf16.mxu1 %v1302_v43  ;;  %870 = vmatprep.mubr.bf16.mxu0 %v1046_v8 }
  0x34   : > { %910 = vmatprep.mubr.bf16.mxu1 %v1048_v11 }
  0x35   : > { %1165 = vmatpush3.bf16.msra.mxu0 %v1303_v44 }
  0x36   : > { %1187 = vmatpush3.bf16.msra.mxu1 %v1304_v45  ;;  %1166 = vmatprep.subr.bf16.mxu0 %v1305_v46 }
  0x37   : > { %1188 = vmatprep.subr.bf16.mxu1 %v1306_v47 }
  0x39   : > { %1167 = vmatpush3.bf16.msra.mxu0 %v1307_v48 }
  0x3a   : > { %1189 = vmatpush3.bf16.msra.mxu1 %v1308_v49  ;;  %1168 = vmatprep.subr.bf16.mxu0 %v1309_v50 }
  0x3b   : > { %1190 = vmatprep.subr.bf16.mxu1 %v1310_v51 }
  0x3d   : > { %1169 = vmatpush3.bf16.msra.mxu0 %v1311_v52 }
  0x3e   : > { %1191 = vmatpush3.bf16.msra.mxu1 %v1312_v53  ;;  %1170 = vmatprep.subr.bf16.mxu0 %v1313_v54 }
  0x3f   : > { %1192 = vmatprep.subr.bf16.mxu1 %v1314_v55 }
  0x41   : > { %1171 = vmatpush3.bf16.msra.mxu0 %v1315_v56 }
  0x42   : > { %1193 = vmatpush3.bf16.msra.mxu1 %v1316_v57  ;;  %1172 = vmatprep.subr.bf16.mxu0 %v1317_v58 }
  0x43   : > { %1194 = vmatprep.subr.bf16.mxu1 %v1318_v59 }
  0x45   : > { %1173 = vmatpush3.bf16.msra.mxu0 %v1319_v60 }
  0x46   : > { %1195 = vmatpush3.bf16.msra.mxu1 %v1320_v61  ;;  %1174 = vmatprep.subr.bf16.mxu0 %v1321_v62 }
  0x47   : > { %1196 = vmatprep.subr.bf16.mxu1 %v1322_v63 }
  0x49   : > { %1175 = vmatpush3.bf16.msra.mxu0 %v1323_v0 }
  0x4a   : > { %1197 = vmatpush3.bf16.msra.mxu1 %v1324_v1  ;;  %1176 = vmatprep.subr.bf16.mxu0 %v1325_v2 }
  0x4b   : > { %1198 = vmatprep.subr.bf16.mxu1 %v1326_v3 }
  0x4d   : > { %1177 = vmatpush3.bf16.msra.mxu0 %v1327_v4 }
  0x4e   : > { %1199 = vmatpush3.bf16.msra.mxu1 %v1328_v5 }
  0x50   : > { %871 = vmatmul.mubr.bf16.vlgmr.msra.gmra.mrb[4].mxu0 %v1045_v7 }
  0x51   : > { %911 = vmatmul.mubr.bf16.vlgmr.msra.gmra.mrb[4].mxu1 %v1047_v10 }
 0x103   : > { %v1134_v12 = vpop.f32.mrb[0].mxu0 }
 0x104   : > { %v1156_v13 = vpop.f32.mrb[0].mxu1  ;;  %v1135_v15 = vpop.f32.mrb[1].mxu0 }
 0x105   : > { %v1157_v16 = vpop.f32.mrb[1].mxu1  ;;  %v1136_v17 = vadd.f32 %v1135_v15, %v1134_v12  ;;  %v1137_v19 = vpop.f32.mrb[2].mxu0 }
 0x106   : > { %v1158_v18 = vadd.f32 %v1157_v16, %v1156_v13  ;;  %v1159_v20 = vpop.f32.mrb[2].mxu1  ;;  %v1138_v21 = vpop.f32.mrb[3].mxu0 }
 0x107   : > { %v1160_v22 = vpop.f32.mrb[3].mxu1  ;;  %v793_v23 = vadd.f32 %v1136_v17, %v1040_v14 }
 0x109   : > { %v833_v24 = vadd.f32 %v1158_v18, %v793_v23 }
 0x123   : > { %v1178_v25 = vpop.f32.mrb[4].mxu0 }
 0x124   : > { %v1200_v26 = vpop.f32.mrb[4].mxu1  ;;  %v1179_v27 = vpop.f32.mrb[5].mxu0 }
 0x125   : > { %v1201_v28 = vpop.f32.mrb[5].mxu1  ;;  %v1180_v29 = vadd.f32 %v1179_v27, %v1178_v25  ;;  %v1181_v31 = vpop.f32.mrb[6].mxu0 }
 0x126   : > { %v1202_v30 = vadd.f32 %v1201_v28, %v1200_v26  ;;  %v1203_v32 = vpop.f32.mrb[6].mxu1  ;;  %v1182_v33 = vpop.f32.mrb[7].mxu0 }
 0x127   : > { %v1204_v34 = vpop.f32.mrb[7].mxu1  ;;  %v873_v35 = vadd.f32 %v1180_v29, %v833_v24 }
 0x129   : > { %v913_v36 = vadd.f32 %v1202_v30, %v873_v35 }
 0x12b   : > { %v919_v37 = vand.u32 2147483647, %v913_v36  ;;  %v918_v48 = vmax.f32 %v913_v36, 0.0 }
 0x12d   : > { %v920_v38 = vsub.f32 0.0, %v919_v37 }
 0x12f   : > { %v921_v39 = vmul.f32 1.442695, %v920_v38 }
 0x131   : > { %1333 = vpow2.f32 %v921_v39 }
 0x13b   : > { %v1334_v40 = vpop.eup %1333 }
 0x13c   : > { %v923_v41 = vadd.f32 1.0, %v1334_v40  ;;  %v926_v42 = vmul.f32 -0.5, %v1334_v40  ;;  %v929_v44 = vand.u32 2147483647, %v1334_v40 }
 0x13e   : > { %1335 = vlog2.f32 %v923_v41  ;;  %v927_v43 = vadd.f32 1.0, %v926_v42  ;;  %vm930_vm0 = vcmp.lt.f32.partialorder %v929_v44, 0.0004427343 }
 0x140   : > { %v928_v47 = vmul.f32 %v1334_v40, %v927_v43 }
 0x148   : > { %v1336_v45 = vpop.eup %1335 }
 0x149   : > { %v925_v46 = vmul.f32 0.6931472, %v1336_v45 }
 0x14b   : > { %v931_v49 = vsel %vm930_vm0, %v928_v47, %v925_v46 }
 0x14c   : > { %v932_v50 = vadd.f32 %v931_v49, %v918_v48 }
 0x14e   : > { %934 = vst.msk [vmem:[%s196_s4] sm:$0xff] %vm933_vm1, %v932_v50 }
 0x14f   : > { %1350 = shalt.err (!%p1347_p5)
}
 0x150   : > { %s1351_s21 = scalar_lea.hbm %s1704_s8, 128  ;;  %s1355_s27 = scalar_lea.hbm %s1754_s3, 256 }
 0x151   : > { %p1352_p6 = scmp.ne.s32.totalorder %s1704_s8, %s1351_s21  ;;  %p1356_p10 = scmp.lt.u32.totalorder %s1704_s8, %s1754_s3 }
 0x152   : > { %p1357_p11 = scmp.lt.u32.totalorder %s1355_s27, %s1351_s21  ;;  %p1359_p13 = scmp.lt.u32.totalorder %s1351_s21, %s1704_s8 }
 0x153   : > { %p1353_p7 = pnand %p1352_p6, %p1478_p4 }
 0x154   : > { %p1358_p12 = por %p1357_p11, %p1356_p10 }
 0x155   : > { %p1354_p9 = pneg %p1353_p7 }
 0x156   : > { %p1360_p0 = por %p1359_p13, %p1358_p12 }
 0x158   : > { %p1361_p1 = pnand %p1360_p0, %p1354_p9 }
 0x15a   : > { %1364 = shalt.err (!%p1361_p1)
}
 0x15b   : > { %1206 = dma.vmem_to_hbm [thread:$0]  (%p1478_p4), %s1706_s5, 128, %s1704_s8, %s936_s9  }
 0x15c PF: > { %p1212_p2 = scmp.ge.s32.totalorder %s1415_s17, 2  ;;  %s963_s29 = sand.u32 1, %s1395_s12  }
 0x15d   : > { %s964_s30 = scalar_lea.sflag [#allocation3], %s963_s29 }
 0x15e   : > { %p1209_p3 = pnand %p1212_p2, %p1485_p8 }
 0x160   : > { %1390 = dma.done.wait (!%p1209_p3), %s964_s30, 128  }
 0x161   : > { %1392 = vsyncadd (!%p1209_p3), %s964_s30, 4294967168  ;;  %s16_s17 = sadd.s32 1, %s1415_s17   ;;  %s1757_s12 = smov %s1399_s13 }
 0x162   : > { %p13_p5 = scmp.ge.s32.totalorder %s16_s17, 4   ;;  %s1758_s13 = smov %s1403_s14 }
 0x163   : > { %s1759_s14 = smov %s1491_s25  ;;  %s1760_s15 = smov %s1411_s16 }
 0x164   : > { %s1761_s16 = smov %s1763_s20  ;;  %15 = sbr.rel (!%p13_p5) target bundleno = 4 (0x4), region = 67 }
 0x16b   :  { %969 = vsyncpa [#allocation3], 1 }
 0x16c   :  { %971 = vsyncpa [#allocation3 + $0x1], 1 }

</bundles_post_ra>
